<compile_context>
chip_gen: v5e
topology: v5e:2x2
jax: 0.10.0
libtpu: 0.0.40
codegen_flags: <defaults>
</compile_context>

<pallas_src>
import functools
from collections import namedtuple
from typing import List, Optional, Tuple, Union

import jax
import jax.numpy as jnp
from jax.experimental import pallas as pl
from jax.experimental.pallas import tpu as pltpu


# ----------------------------- Pallas kernel ------------------------------ #
def _conv3x3_bias_relu_kernel(x_ref, w_ref, b_ref, o_ref, *, H, W):
    """Fused 3x3 SAME conv + bias + ReLU for one batch element, NC(HW) layout.

    x_ref: (1, Cin, H*W)   f32  input (channels on sublanes, H*W on lanes)
    w_ref: (Cout, 9*Cin)   bf16 weights, column index = (kh*3 + kw)*Cin + ci
    b_ref: (Cout, 1)       f32  bias
    o_ref: (1, Cout, H*W)  f32  output (lane-dense store: last dim = H*W)
    """
    Cin = x_ref.shape[1]
    HW = x_ref.shape[2]
    Cout = o_ref.shape[1]

    x = x_ref[0]  # (Cin, HW) f32

    # Flattened spatial index / column index, for SAME-padding edge masking.
    pos = jax.lax.broadcasted_iota(jnp.int32, (Cin, HW), 1)
    col = pos % W

    # Build the im2col patch: 9 lane-shifted copies of x with out-of-image
    # positions zeroed.  Shifts are static (slice+concat on the XLU), masks
    # are VPU selects; both hide under MXU/DMA slack.
    taps = []
    for kh in range(3):
        dh = kh - 1
        for kw in range(3):
            dw = kw - 1
            off = dh * W + dw
            shifted = x if off == 0 else jnp.roll(x, shift=-off, axis=1)
            conds = []
            if dw < 0:
                conds.append(col >= -dw)
            elif dw > 0:
                conds.append(col < W - dw)
            if dh < 0:
                conds.append(pos >= (-dh) * W)
            elif dh > 0:
                conds.append(pos < HW - dh * W)
            if conds:
                mask = conds[0]
                for c in conds[1:]:
                    mask = jnp.logical_and(mask, c)
                shifted = jnp.where(mask, shifted, 0.0)
            taps.append(shifted)

    patch = jnp.concatenate(taps, axis=0).astype(jnp.bfloat16)  # (9*Cin, HW)

    # One MXU matmul: (Cout, 9*Cin) @ (9*Cin, H*W) -> (Cout, H*W), f32 accum.
    acc = jnp.dot(w_ref[...], patch, preferred_element_type=jnp.float32)

    out = jnp.maximum(acc + b_ref[...], 0.0)       # bias + ReLU fused here
    o_ref[...] = out.reshape(1, Cout, HW).astype(o_ref.dtype)


def conv3x3_bias_relu(x_nchw: jax.Array, w_mat_bf16: jax.Array,
                      b_col: jax.Array) -> jax.Array:
    """x: (N, Cin, H, W) f32; w_mat: (Cout, 9*Cin) bf16; b_col: (Cout, 1) f32
    -> (N, Cout, H, W) f32."""
    N, Cin, H, W = x_nchw.shape
    Cout = w_mat_bf16.shape[0]
    HW = H * W

    # Free (contiguous) reshape: keep NCHW, put the spatial axis on the lanes.
    x_flat = x_nchw.reshape(N, Cin, HW)

    out_flat = pl.pallas_call(
        functools.partial(_conv3x3_bias_relu_kernel, H=H, W=W),
        out_shape=jax.ShapeDtypeStruct((N, Cout, HW), jnp.float32),
        grid_spec=pltpu.PrefetchScalarGridSpec(
            num_scalar_prefetch=0,
            grid=(N,),
            in_specs=[
                pl.BlockSpec((1, Cin, HW), lambda n: (n, 0, 0)),
                # Constant-index weight/bias blocks (revisited -> no re-DMA).
                pl.BlockSpec((Cout, 9 * Cin), lambda n: (0, 0)),
                pl.BlockSpec((Cout, 1), lambda n: (0, 0)),
            ],
            out_specs=pl.BlockSpec((1, Cout, HW), lambda n: (n, 0, 0)),
        ),
        compiler_params=pltpu.CompilerParams(
            dimension_semantics=("parallel",),
            vmem_limit_bytes=32 * 1024 * 1024,
        ),
    )(x_flat, w_mat_bf16, b_col)

    # Free contiguous reshape back to NCHW (matches PyTorch/TRT binding layout).
    return out_flat.reshape(N, Cout, H, W)


# --------------------------- TRTModule analogue ---------------------------- #
TensorInfo = namedtuple("Tensor", ("name", "dtype", "shape"))


class TRTModule:
    """JAX/Pallas analogue of the TensorRT execution wrapper.

    The serialized engine is replaced by a deterministic synthetic network
    (conv3x3 + bias + ReLU).  Interface semantics (binding counts, output
    selection via set_desired, tuple-vs-single return) follow the original.
    """

    def __init__(self, key: jax.Array, in_shape=(2, 4, 16, 16), out_channels=8):
        N, Cin, H, W = in_shape
        Cout = out_channels
        k_w, k_b = jax.random.split(key)
        # Deterministic "engine weights" (kept in OIHW f32 for reference use).
        self.w = (jax.random.normal(k_w, (Cout, Cin, 3, 3), jnp.float32)
                  * (1.0 / (Cin * 9) ** 0.5))
        self.b = jax.random.normal(k_b, (Cout,), jnp.float32) * 0.1

        # Pre-packed kernel operands: (Cout, 9*Cin) bf16 with column index
        # (kh*3 + kw)*Cin + ci, and a (Cout, 1) f32 bias column.
        self.w_mat = (jnp.transpose(self.w, (0, 2, 3, 1))
                      .reshape(Cout, 9 * Cin).astype(jnp.bfloat16))
        self.b_col = self.b.reshape(Cout, 1)

        self.num_inputs = 1
        self.num_outputs = 1
        self.num_bindings = 2
        self.input_names = ["images"]
        self.output_names = ["features"]
        self.inp_info = [TensorInfo("images", jnp.float32, (N, Cin, H, W))]
        self.out_info = [TensorInfo("features", jnp.float32, (N, Cout, H, W))]
        self.idynamic = False
        self.odynamic = False
        self.idx = list(range(self.num_outputs))

    def set_desired(self, desired: Optional[Union[List, Tuple]]):
        if isinstance(desired, (list, tuple)) and len(desired) == self.num_outputs:
            self.idx = [self.output_names.index(i) for i in desired]

    def forward(self, *inputs) -> Union[Tuple, jax.Array]:
        assert len(inputs) == self.num_inputs
        contiguous_inputs = [jnp.asarray(i, jnp.float32) for i in inputs]
        outputs: List[jax.Array] = [
            conv3x3_bias_relu(contiguous_inputs[0], self.w_mat, self.b_col)
        ]
        return (tuple(outputs[i] for i in self.idx)
                if len(outputs) > 1 else outputs[0])

    __call__ = forward


# --------------------------------- main ------------------------------------ #
if __name__ == "__main__":
    key = jax.random.PRNGKey(0)
    k_mod, k_x = jax.random.split(key)

    module = TRTModule(k_mod, in_shape=(2, 4, 16, 16), out_channels=8)
    x = jax.random.normal(k_x, (2, 4, 16, 16), jnp.float32)

    out = module(x)
    out = jax.block_until_ready(out)
    assert out.shape == (2, 8, 16, 16)

    # Tight check: reference with bf16-rounded operands (matches the kernel's
    # bf16 MXU inputs with f32 accumulation).
    x_q = x.astype(jnp.bfloat16).astype(jnp.float32)
    w_q = module.w.astype(jnp.bfloat16).astype(jnp.float32)
    ref_q = jax.lax.conv_general_dilated(
        x_q, w_q, window_strides=(1, 1), padding="SAME",
        dimension_numbers=("NCHW", "OIHW", "NCHW"),
        precision=jax.lax.Precision.HIGHEST)
    ref_q = jnp.maximum(ref_q + module.b.reshape(1, -1, 1, 1), 0.0)
    assert jnp.allclose(out, ref_q, rtol=2e-3, atol=2e-3), float(
        jnp.max(jnp.abs(out - ref_q)))

    # Loose check against the pure-f32 reference (bf16 quantization noise).
    ref = jax.lax.conv_general_dilated(
        x, module.w, window_strides=(1, 1), padding="SAME",
        dimension_numbers=("NCHW", "OIHW", "NCHW"),
        precision=jax.lax.Precision.HIGHEST)
    ref = jnp.maximum(ref + module.b.reshape(1, -1, 1, 1), 0.0)
    assert jnp.allclose(out, ref, rtol=2e-2, atol=2e-2), float(
        jnp.max(jnp.abs(out - ref)))

    print("KERNEL_OK")
</pallas_src>

<mosaic_0001>
module attributes {stable_mosaic.version = 11 : i64} {
  func.func @_conv3x3_bias_relu_kernel(%arg0: i32, %arg1: memref<1x4x256xf32, #tpu.memory_space<vmem>>, %arg2: memref<8x36xbf16, #tpu.memory_space<vmem>>, %arg3: memref<8x1xf32, #tpu.memory_space<vmem>>, %arg4: memref<1x8x256xf32, #tpu.memory_space<vmem>>) attributes {dimension_semantics = [#tpu.dimension_semantics<parallel>], iteration_bounds = array<i64: 2>, scalar_prefetch = 0 : i64, scratch_operands = 0 : i64, tpu.core_type = #tpu.core_type<tc>, window_params = [{transform_indices = @transform_0, window_bounds = array<i64: 1, 4, 256>}, {pipeline_mode = #tpu.pipeline_mode<synchronous>, transform_indices = @transform_1, window_bounds = array<i64: 8, 36>}, {pipeline_mode = #tpu.pipeline_mode<synchronous>, transform_indices = @transform_2, window_bounds = array<i64: 8, 1>}, {transform_indices = @transform_3, window_bounds = array<i64: 1, 8, 256>}]} {
    %c0 = arith.constant 0 : index
    %c0_0 = arith.constant 0 : index
    %c0_1 = arith.constant 0 : index
    %0 = vector.load %arg1[%c0, %c0_0, %c0_1] : memref<1x4x256xf32, #tpu.memory_space<vmem>>, vector<1x4x256xf32>
    %1 = vector.shape_cast %0 : vector<1x4x256xf32> to vector<4x256xf32>
    %2 = tpu.iota {dimensions = array<i32: 1>} : vector<4x256xi32>
    %c16_i32 = arith.constant 16 : i32
    %c0_i32 = arith.constant 0 : i32
    %3 = arith.cmpi eq, %c16_i32, %c0_i32 : i32
    %c1_i32 = arith.constant 1 : i32
    %4 = arith.select %3, %c1_i32, %c16_i32 : i32
    %5 = vector.broadcast %4 : i32 to vector<4x256xi32>
    %6 = arith.remsi %2, %5 : vector<4x256xi32>
    %c0_i32_2 = arith.constant 0 : i32
    %7 = vector.broadcast %c0_i32_2 : i32 to vector<4x256xi32>
    %8 = arith.cmpi ne, %6, %7 : vector<4x256xi32>
    %c0_i32_3 = arith.constant 0 : i32
    %9 = vector.broadcast %c0_i32_3 : i32 to vector<4x256xi32>
    %10 = arith.cmpi slt, %6, %9 : vector<4x256xi32>
    %c0_i32_4 = arith.constant 0 : i32
    %11 = arith.cmpi slt, %4, %c0_i32_4 : i32
    %12 = vector.broadcast %11 : i1 to vector<4x256xi1>
    %13 = vector.broadcast %12 : vector<4x256xi1> to vector<4x256xi1>
    %14 = arith.xori %10, %13 : vector<4x256xi1>
    %15 = arith.andi %14, %8 : vector<4x256xi1>
    %16 = vector.broadcast %4 : i32 to vector<4x256xi32>
    %17 = arith.addi %6, %16 : vector<4x256xi32>
    %18 = arith.select %15, %17, %6 : vector<4x256xi1>, vector<4x256xi32>
    %19 = vector.extract_strided_slice %1 {offsets = [0, 239], sizes = [4, 17], strides = [1, 1]} : vector<4x256xf32> to vector<4x17xf32>
    %20 = vector.extract_strided_slice %1 {offsets = [0, 0], sizes = [4, 239], strides = [1, 1]} : vector<4x256xf32> to vector<4x239xf32>
    %21 = tpu.concatenate %19, %20 in 1 : vector<4x17xf32>, vector<4x239xf32> -> vector<4x256xf32>
    %c1_i32_5 = arith.constant 1 : i32
    %22 = vector.broadcast %c1_i32_5 : i32 to vector<4x256xi32>
    %23 = arith.cmpi sge, %18, %22 : vector<4x256xi32>
    %c16_i32_6 = arith.constant 16 : i32
    %24 = vector.broadcast %c16_i32_6 : i32 to vector<4x256xi32>
    %25 = arith.cmpi sge, %2, %24 : vector<4x256xi32>
    %26 = arith.andi %23, %25 : vector<4x256xi1>
    %cst = arith.constant 0.000000e+00 : f32
    %27 = vector.broadcast %cst : f32 to vector<4x256xf32>
    %28 = arith.select %26, %21, %27 : vector<4x256xi1>, vector<4x256xf32>
    %29 = vector.extract_strided_slice %1 {offsets = [0, 240], sizes = [4, 16], strides = [1, 1]} : vector<4x256xf32> to vector<4x16xf32>
    %30 = vector.extract_strided_slice %1 {offsets = [0, 0], sizes = [4, 240], strides = [1, 1]} : vector<4x256xf32> to vector<4x240xf32>
    %31 = tpu.concatenate %29, %30 in 1 : vector<4x16xf32>, vector<4x240xf32> -> vector<4x256xf32>
    %c16_i32_7 = arith.constant 16 : i32
    %32 = vector.broadcast %c16_i32_7 : i32 to vector<4x256xi32>
    %33 = arith.cmpi sge, %2, %32 : vector<4x256xi32>
    %cst_8 = arith.constant 0.000000e+00 : f32
    %34 = vector.broadcast %cst_8 : f32 to vector<4x256xf32>
    %35 = arith.select %33, %31, %34 : vector<4x256xi1>, vector<4x256xf32>
    %36 = vector.extract_strided_slice %1 {offsets = [0, 241], sizes = [4, 15], strides = [1, 1]} : vector<4x256xf32> to vector<4x15xf32>
    %37 = vector.extract_strided_slice %1 {offsets = [0, 0], sizes = [4, 241], strides = [1, 1]} : vector<4x256xf32> to vector<4x241xf32>
    %38 = tpu.concatenate %36, %37 in 1 : vector<4x15xf32>, vector<4x241xf32> -> vector<4x256xf32>
    %c15_i32 = arith.constant 15 : i32
    %39 = vector.broadcast %c15_i32 : i32 to vector<4x256xi32>
    %40 = arith.cmpi slt, %18, %39 : vector<4x256xi32>
    %c16_i32_9 = arith.constant 16 : i32
    %41 = vector.broadcast %c16_i32_9 : i32 to vector<4x256xi32>
    %42 = arith.cmpi sge, %2, %41 : vector<4x256xi32>
    %43 = arith.andi %40, %42 : vector<4x256xi1>
    %cst_10 = arith.constant 0.000000e+00 : f32
    %44 = vector.broadcast %cst_10 : f32 to vector<4x256xf32>
    %45 = arith.select %43, %38, %44 : vector<4x256xi1>, vector<4x256xf32>
    %46 = vector.extract_strided_slice %1 {offsets = [0, 255], sizes = [4, 1], strides = [1, 1]} : vector<4x256xf32> to vector<4x1xf32>
    %47 = vector.extract_strided_slice %1 {offsets = [0, 0], sizes = [4, 255], strides = [1, 1]} : vector<4x256xf32> to vector<4x255xf32>
    %48 = tpu.concatenate %46, %47 in 1 : vector<4x1xf32>, vector<4x255xf32> -> vector<4x256xf32>
    %c1_i32_11 = arith.constant 1 : i32
    %49 = vector.broadcast %c1_i32_11 : i32 to vector<4x256xi32>
    %50 = arith.cmpi sge, %18, %49 : vector<4x256xi32>
    %cst_12 = arith.constant 0.000000e+00 : f32
    %51 = vector.broadcast %cst_12 : f32 to vector<4x256xf32>
    %52 = arith.select %50, %48, %51 : vector<4x256xi1>, vector<4x256xf32>
    %53 = vector.extract_strided_slice %1 {offsets = [0, 1], sizes = [4, 255], strides = [1, 1]} : vector<4x256xf32> to vector<4x255xf32>
    %54 = vector.extract_strided_slice %1 {offsets = [0, 0], sizes = [4, 1], strides = [1, 1]} : vector<4x256xf32> to vector<4x1xf32>
    %55 = tpu.concatenate %53, %54 in 1 : vector<4x255xf32>, vector<4x1xf32> -> vector<4x256xf32>
    %c15_i32_13 = arith.constant 15 : i32
    %56 = vector.broadcast %c15_i32_13 : i32 to vector<4x256xi32>
    %57 = arith.cmpi slt, %18, %56 : vector<4x256xi32>
    %cst_14 = arith.constant 0.000000e+00 : f32
    %58 = vector.broadcast %cst_14 : f32 to vector<4x256xf32>
    %59 = arith.select %57, %55, %58 : vector<4x256xi1>, vector<4x256xf32>
    %60 = vector.extract_strided_slice %1 {offsets = [0, 15], sizes = [4, 241], strides = [1, 1]} : vector<4x256xf32> to vector<4x241xf32>
    %61 = vector.extract_strided_slice %1 {offsets = [0, 0], sizes = [4, 15], strides = [1, 1]} : vector<4x256xf32> to vector<4x15xf32>
    %62 = tpu.concatenate %60, %61 in 1 : vector<4x241xf32>, vector<4x15xf32> -> vector<4x256xf32>
    %c1_i32_15 = arith.constant 1 : i32
    %63 = vector.broadcast %c1_i32_15 : i32 to vector<4x256xi32>
    %64 = arith.cmpi sge, %18, %63 : vector<4x256xi32>
    %c240_i32 = arith.constant 240 : i32
    %65 = vector.broadcast %c240_i32 : i32 to vector<4x256xi32>
    %66 = arith.cmpi slt, %2, %65 : vector<4x256xi32>
    %67 = arith.andi %64, %66 : vector<4x256xi1>
    %cst_16 = arith.constant 0.000000e+00 : f32
    %68 = vector.broadcast %cst_16 : f32 to vector<4x256xf32>
    %69 = arith.select %67, %62, %68 : vector<4x256xi1>, vector<4x256xf32>
    %70 = vector.extract_strided_slice %1 {offsets = [0, 16], sizes = [4, 240], strides = [1, 1]} : vector<4x256xf32> to vector<4x240xf32>
    %71 = vector.extract_strided_slice %1 {offsets = [0, 0], sizes = [4, 16], strides = [1, 1]} : vector<4x256xf32> to vector<4x16xf32>
    %72 = tpu.concatenate %70, %71 in 1 : vector<4x240xf32>, vector<4x16xf32> -> vector<4x256xf32>
    %c240_i32_17 = arith.constant 240 : i32
    %73 = vector.broadcast %c240_i32_17 : i32 to vector<4x256xi32>
    %74 = arith.cmpi slt, %2, %73 : vector<4x256xi32>
    %cst_18 = arith.constant 0.000000e+00 : f32
    %75 = vector.broadcast %cst_18 : f32 to vector<4x256xf32>
    %76 = arith.select %74, %72, %75 : vector<4x256xi1>, vector<4x256xf32>
    %77 = vector.extract_strided_slice %1 {offsets = [0, 17], sizes = [4, 239], strides = [1, 1]} : vector<4x256xf32> to vector<4x239xf32>
    %78 = vector.extract_strided_slice %1 {offsets = [0, 0], sizes = [4, 17], strides = [1, 1]} : vector<4x256xf32> to vector<4x17xf32>
    %79 = tpu.concatenate %77, %78 in 1 : vector<4x239xf32>, vector<4x17xf32> -> vector<4x256xf32>
    %c15_i32_19 = arith.constant 15 : i32
    %80 = vector.broadcast %c15_i32_19 : i32 to vector<4x256xi32>
    %81 = arith.cmpi slt, %18, %80 : vector<4x256xi32>
    %c240_i32_20 = arith.constant 240 : i32
    %82 = vector.broadcast %c240_i32_20 : i32 to vector<4x256xi32>
    %83 = arith.cmpi slt, %2, %82 : vector<4x256xi32>
    %84 = arith.andi %81, %83 : vector<4x256xi1>
    %cst_21 = arith.constant 0.000000e+00 : f32
    %85 = vector.broadcast %cst_21 : f32 to vector<4x256xf32>
    %86 = arith.select %84, %79, %85 : vector<4x256xi1>, vector<4x256xf32>
    %87 = tpu.concatenate %28, %35, %45, %52, %1, %59, %69, %76, %86 in 0 : vector<4x256xf32>, vector<4x256xf32>, vector<4x256xf32>, vector<4x256xf32>, vector<4x256xf32>, vector<4x256xf32>, vector<4x256xf32>, vector<4x256xf32>, vector<4x256xf32> -> vector<36x256xf32>
    %88 = arith.truncf %87 : vector<36x256xf32> to vector<36x256xbf16>
    %c0_22 = arith.constant 0 : index
    %c0_23 = arith.constant 0 : index
    %89 = vector.load %arg2[%c0_22, %c0_23] : memref<8x36xbf16, #tpu.memory_space<vmem>>, vector<8x36xbf16>
    %cst_24 = arith.constant dense<0.000000e+00> : vector<8x256xf32>
    %90 = tpu.matmul %89, %88, %cst_24 {dimension_numbers = #tpu.dot_dimension_numbers<[1], [0], [0], [1], [0, 0, 1, 1], [], []>} : vector<8x36xbf16>, vector<36x256xbf16>, vector<8x256xf32> -> vector<8x256xf32>
    %c0_25 = arith.constant 0 : index
    %c0_26 = arith.constant 0 : index
    %91 = vector.load %arg3[%c0_25, %c0_26] : memref<8x1xf32, #tpu.memory_space<vmem>>, vector<8x1xf32>
    %92 = vector.broadcast %91 : vector<8x1xf32> to vector<8x256xf32>
    %93 = arith.addf %90, %92 : vector<8x256xf32>
    %cst_27 = arith.constant 0.000000e+00 : f32
    %94 = vector.broadcast %cst_27 : f32 to vector<8x256xf32>
    %95 = arith.maximumf %93, %94 : vector<8x256xf32>
    %96 = vector.shape_cast %95 : vector<8x256xf32> to vector<1x8x256xf32>
    %c0_28 = arith.constant 0 : index
    %c0_29 = arith.constant 0 : index
    %c0_30 = arith.constant 0 : index
    %97 = vector.load %arg4[%c0_28, %c0_29, %c0_30] : memref<1x8x256xf32, #tpu.memory_space<vmem>>, vector<1x8x256xf32>
    tpu.vector_store %arg4[%c0_28, %c0_29, %c0_30], %96 {strides = array<i32>} : memref<1x8x256xf32, #tpu.memory_space<vmem>>, vector<1x8x256xf32>,
    return
  }
  func.func @transform_0(%arg0: i32) -> (i32, i32, i32) {
    %c0_i32 = arith.constant 0 : i32
    %c0_i32_0 = arith.constant 0 : i32
    %c0_i32_1 = arith.constant 0 : i32
    return %arg0, %c0_i32, %c0_i32_0 : i32, i32, i32
  }
  func.func @transform_1(%arg0: i32) -> (i32, i32) {
    %c0_i32 = arith.constant 0 : i32
    %c0_i32_0 = arith.constant 0 : i32
    %c0_i32_1 = arith.constant 0 : i32
    return %c0_i32, %c0_i32_0 : i32, i32
  }
  func.func @transform_2(%arg0: i32) -> (i32, i32) {
    %c0_i32 = arith.constant 0 : i32
    %c0_i32_0 = arith.constant 0 : i32
    %c0_i32_1 = arith.constant 0 : i32
    return %c0_i32, %c0_i32_0 : i32, i32
  }
  func.func @transform_3(%arg0: i32) -> (i32, i32, i32) {
    %c0_i32 = arith.constant 0 : i32
    %c0_i32_0 = arith.constant 0 : i32
    %c0_i32_1 = arith.constant 0 : i32
    return %arg0, %c0_i32, %c0_i32_0 : i32, i32, i32
  }
}

</mosaic_0001>

<bundles_post_ra>
// kernel: tpu_custom_call.1
= control target key start
LH: loop header
LB: loop body
LE: loop exit
PB: predicated region body
PF: predicated region fallthrough
CT: control target
= control target key end

     0   :  { %8 = vsyncpa [#allocation3], 0  ;;  %s1110_s0 = inlined_call_operand.hbm [shape: f32[2,4,256], index: 0, kind: input, shape index: {}]   ;;  %s1111_s1 = inlined_call_operand.vmem [shape: bf16[8,36], index: 1, kind: input, shape index: {}]   ;;  %s1112_s2 = inlined_call_operand.vmem [shape: f32[8,1], index: 2, kind: input, shape index: {}]   ;;  %s1113_s3 = inlined_call_operand.hbm [shape: f32[2,8,256], index: 3, kind: output, shape index: {}]  }
   0x1   :  { %10 = vsyncpa [#allocation3 + $0x1], 0 }
   0x2   :  { %11 = vsyncpa [#allocation4], 0 }
   0x3   :  { %13 = vsyncpa [#allocation4 + $0x1], 0  ;;  %s808_s12 = smov 0   ;;  %s810_s13 = smov 0  }
   0x4   :  { %s812_s14 = smov 0   ;;  %s814_s15 = smov 0  }
   0x5 LB: > { %s829_s16 = sadd.s32 4294967295, %s777_s15   ;;  %s566_s17 = sadd.s32 4294967294, %s777_s15   ;;  %s777_s15 = sphi %s814_s15, %s1137_s15   ;;  %s773_s14 = sphi %s812_s14, %s1136_s14   ;;  %s769_s13 = sphi %s810_s13, %s1135_s13   ;;  %s765_s12 = sphi %s808_s12, %s1134_s12  }
   0x6   : > { %s833_s18 = sadd.s32 1, %s777_s15   ;;  %s26_s19 = sadd.s32 1, %s773_s14 }
   0x7   : > { %s23_s20 = ssub.s32 %s777_s15, %s833_s18  ;;  %p33_p0 = scmp.ne.s32.totalorder %s773_s14, %s769_s13 }
   0x8   : > { %p24_p1 = scmp.eq.s32.totalorder %s23_s20, 0  ;;  %p34_p2 = scmp.eq.s32.totalorder %s777_s15, 0 }
   0x9   : > { %p39_p3 = scmp.ne.s32.totalorder %s769_s13, %s765_s12  ;;  %p40_p4 = scmp.eq.s32.totalorder %s829_s16, 0 }
   0xa   : > { %s845_s21 = scalar_select %p24_p1, %s773_s14, %s26_s19  }
   0xb   : > { %p847_p5 = por %p34_p2, %p33_p0  ;;  %p851_p6 = por %p40_p4, %p39_p3 }
   0xc   : > { %p105_p7 = scmp.eq.s32.totalorder %s829_s16, 1  ;;  %p111_p8 = scmp.eq.s32.totalorder %s566_s17, 1 }
   0xd   : > { %p596_p10 = scmp.lt.s32.totalorder %s777_s15, 2  ;;  %s137_s26 = sand.u32 1, %s773_s14  }
   0xe   : > { %p858_p11 = por %p105_p7, %p33_p0  ;;  %p862_p12 = por %p111_p8, %p39_p3 }
   0xf   : > { %s582_s27 = sshll.u32 %s777_s15, 3  ;;  %s569_s28 = sshll.u32 %s137_s26, 3 }
  0x10   : > { %s146_s4 = scalar_lea.hbm %s1110_s0, %s582_s27  ;;  %s141_s6 = scalar_lea.vmem [#allocation2], %s569_s28 }
  0x11   : > { %s148_s5 = sshll.u32 %s146_s4, 4  ;;  %s150_s7 = sshll.u32 %s141_s6, 4  ;;  %s149_s5 = int_to_ptr.hbm [resolvable:$true] %s148_s5  ;;  %s151_s7 = int_to_ptr.vmem [resolvable:$true] %s150_s7 }
  0x12   : > { %p873_p13 = pnand %p596_p10, %p847_p5  ;;  %p572_p0 = scmp.ge.s32.totalorder %s777_s15, 1 }
  0x13   : > { %p155_p1 = scmp.lt.s32.totalorder %s777_s15, 3  ;;  %s138_s9 = scalar_lea.sflag [#allocation3], %s137_s26 }
  0x14   : > { %s681_s10 = sshra.s32 %s149_s5, 4  ;;  %p685_p3 = pneg %p873_p13  ;;  %s682_s10 = int_to_ptr.hbm [resolvable:$true] %s681_s10 }
  0x15   : > { %s683_s11 = scalar_lea.hbm %s682_s10, 8  ;;  %s688_s20 = scalar_lea.hbm %s1110_s0, 16 }
  0x16   : > { %p684_p2 = scmp.ne.s32.totalorder %s682_s10, %s683_s11  ;;  %p689_p5 = scmp.lt.s32.totalorder %s682_s10, %s1110_s0 }
  0x17   : > { %p690_p8 = scmp.lt.s32.totalorder %s688_s20, %s683_s11 }
  0x18   : > { %p686_p4 = pnand %p685_p3, %p684_p2 }
  0x19   : > { %p691_p10 = por %p690_p8, %p689_p5 }
  0x1a   : > { %p687_p7 = pneg %p686_p4 }
  0x1c   : > { %p692_p9 = pnand %p691_p10, %p687_p7 }
  0x1e   : > { %695 = shalt.err (!%p692_p9)
}
  0x1f   : > { %591 = dma.hbm_to_vmem [thread:$0]  (!%p873_p13), %s149_s5, 128, %s151_s7, %s138_s9  }
  0x20   : > { %p156_p2 = pnand %p572_p0, %p155_p1 }
  0x21   : > { %s894_s26 = sand.u32 (!%p156_p2), 1, %s769_s13  }
  0x22   : > { %159 = sbr.rel (%p156_p2) target bundleno = 436 (0x1b4), region = 32  ;;  %s573_s28 = sshll.u32 (!%p156_p2), %s894_s26, 3 }
  0x23   : > { %s162_s29 = scalar_lea.sflag (!%p156_p2), [#allocation3], %s894_s26  ;;  %s165_s30 = scalar_lea.vmem (!%p156_p2), [#allocation2], %s573_s28 }
  0x27   : > { %756 = dma.done.wait (%p851_p6), %s162_s29, 128  }
  0x28   : > { %758 = vsyncadd (%p851_p6), %s162_s29, 4294967168  ;;  %v902_v0 = vld [vmem:[%s165_s30] sm:$0xff]  ;;  %s779_s23 = smov 17   ;;  %s780_s4 = smov 16   ;;  %v191_v40 = vlaneseq  ;;  %vm256_vm0 = vcmask 130048   ;;  %v432_v50 = vld [vmem:[%s1112_s2] sm:$0xff] }
  0x29   : > { %219 = vst [vmem:[#allocation1] ss:$2 sm:$0xff] %v902_v0  ;;  %s781_s5 = smov 1   ;;  %s782_s6 = smov 127   ;;  %vm312_vm1 = vcmask 1039360   ;;  %v787_v54 = vmov 0  }
  0x2a   : > { %s783_s7 = smov 113   ;;  %s784_s8 = smov 112   ;;  %v933_v41 = vand.u32 127, %v191_v40  ;;  %679 = vset.pattern.permute.xlu1 %v787_v54  ;;  %680 = vset.pattern.permute.xlu0 %v787_v54  ;;  %vm298_vm2 = vcmask 7168   ;;  %vm354_vm4 = vcmask 916480   ;;  %vm331_vm5 = vcmask 924672  }
  0x2b   : > { %s785_s9 = smov 15   ;;  %s786_s10 = smov 111   ;;  %vm231_vm6 = vcmask 138240   ;;  %vm275_vm10 = vcmask 121856   ;;  %vm373_vm12 = vcmask 908288   ;;  %vm442_vm14 = vcmask 1041408  }
  0x2c   : > { %v938_v45 = vadd.s32 128, %v933_v41  ;;  %v198_v53 = vand.u32 15, %v933_v41  ;;  %vm238_vm11 = vcmp.ge.s32.totalorder %v933_v41, 16  ;;  %s574_s22 = sshll.u32 %s894_s26, 4  ;;  %s583_s27 = sshll.u32 %s829_s16, 4 }
  0x2d   : > { %s491_s30 = scalar_lea.hbm %s1113_s3, %s583_s27 }
  0x2e   : > { %v205_v52 = vand.u32 15, %v938_v45  ;;  %vm967_vm8 = vcmp.lt.s32.totalorder %v198_v53, 15  ;;  %vm971_vm9 = vcmp.ge.s32.totalorder %v198_v53, 1  ;;  %vm342_vm13 = vcmp.lt.s32.totalorder %v938_v45, 240 }
  0x2f   : > { %vm1001_vm15 = vmand %vm971_vm9, %vm238_vm11 }
  0x30   : > { %v220_v1 = vld.sshfl [vmem:[#allocation1 + $0x8] sm:$0xff pattern:$0x75316420]  ;;  %vm956_vm3 = vcmp.lt.s32.totalorder %v205_v52, 15  ;;  %vm963_vm7 = vcmp.ge.s32.totalorder %v205_v52, 1 }
  0x31   : > { %224 = vst [vmem:[#allocation1] ss:$2 sm:$0xff] %v902_v0 }
  0x38   : > { %v225_v2 = vld.sshfl [vmem:[#allocation1] sm:$0xff pattern:$0x75316420]  ;;  %v226_v3 = vld.sshfl [vmem:[#allocation1 + $0x8] sm:$0xff pattern:$0x75316420] }
  0x39   : > { %244 = vst [vmem:[#allocation1] ss:$2 sm:$0xff] %v902_v0  ;;  %v639_v8 = vpack.i.bf16 %v225_v2, %v220_v1 }
  0x3b   : > { %640 = vrot.lane.b32.xlu0 %v639_v8, %s779_s23 }
  0x40   : > { %v245_v4 = vld.sshfl [vmem:[#allocation1 + $0x8] sm:$0xff pattern:$0x75316420] }
  0x41   : > { %249 = vst [vmem:[#allocation1] ss:$2 sm:$0xff] %v902_v0 }
  0x48   : > { %v250_v5 = vld.sshfl [vmem:[#allocation1] sm:$0xff pattern:$0x75316420]  ;;  %v251_v6 = vld.sshfl [vmem:[#allocation1 + $0x8] sm:$0xff pattern:$0x75316420] }
  0x49   : > { %263 = vst [vmem:[#allocation1] ss:$2 sm:$0xff] %v902_v0  ;;  %v644_v12 = vpack.i.bf16 %v250_v5, %v245_v4 }
  0x4b   : > { %645 = vrot.lane.b32.xlu2 %v644_v12, %s780_s4 }
  0x50   : > { %v264_v7 = vld.sshfl [vmem:[#allocation1 + $0x8] sm:$0xff pattern:$0x75316420] }
  0x51   : > { %268 = vst [vmem:[#allocation1] ss:$2 sm:$0xff] %v902_v0 }
  0x53   : > { %254 = vrot.lane.b32.xlu2 %v251_v6, %s780_s4 }
  0x58   : > { %v269_v9 = vld.sshfl [vmem:[#allocation1] sm:$0xff pattern:$0x75316420]  ;;  %v270_v10 = vld.sshfl [vmem:[#allocation1 + $0x8] sm:$0xff pattern:$0x75316420] }
  0x59   : > { %286 = vst [vmem:[#allocation1] ss:$2 sm:$0xff] %v902_v0  ;;  %v674_v28 = vpack.i.bf16 %v269_v9, %v264_v7 }
  0x60   : > { %v287_v11 = vld.sshfl [vmem:[#allocation1 + $0x8] sm:$0xff pattern:$0x75316420] }
  0x61   : > { %291 = vst [vmem:[#allocation1] ss:$2 sm:$0xff] %v902_v0 }
  0x68   : > { %v293_v13 = vld.sshfl [vmem:[#allocation1 + $0x8] sm:$0xff pattern:$0x75316420]  ;;  %v292_v14 = vld.sshfl [vmem:[#allocation1] sm:$0xff pattern:$0x75316420] }
  0x69   : > { %296 = vrot.lane.b32.xlu1 %v293_v13, %s781_s5  ;;  %305 = vst [vmem:[#allocation1] ss:$2 sm:$0xff] %v902_v0  ;;  %v649_v15 = vpack.i.bf16 %v292_v14, %v287_v11 }
  0x6b   : > { %650 = vrot.lane.b32.xlu0 %v649_v15, %s781_s5  ;;  %s495_s5 = sshll.u32 %s491_s30, 4  ;;  %s496_s5 = int_to_ptr.hbm [resolvable:$true] %s495_s5 }
  0x6c   : > { %s725_s16 = sshra.s32 %s496_s5, 4  ;;  %s726_s16 = int_to_ptr.hbm [resolvable:$true] %s725_s16 }
  0x6d   : > { %p732_p0 = scmp.lt.s32.totalorder %s726_s16, %s1113_s3 }
  0x70   : > { %v306_v16 = vld.sshfl [vmem:[#allocation1] sm:$0xff pattern:$0x75316420]  ;;  %v307_v17 = vld.sshfl [vmem:[#allocation1 + $0x8] sm:$0xff pattern:$0x75316420] }
  0x71   : > { %v654_v18 = vpack.i.bf16 %v307_v17, %v306_v16  ;;  %316 = vst [vmem:[#allocation1] ss:$2 sm:$0xff] %v902_v0 }
  0x73   : > { %655 = vrot.lane.b32.xlu1 %v654_v18, %s782_s6 }
  0x78   : > { %v317_v19 = vld.sshfl [vmem:[#allocation1] sm:$0xff pattern:$0x75316420] }
  0x79   : > { %324 = vst [vmem:[#allocation1] ss:$2 sm:$0xff] %v902_v0 }
  0x7b   : > { %318 = vrot.lane.b32.xlu1 %v317_v19, %s782_s6  ;;  %s480_s6 = scalar_lea.sflag [#allocation4], %s894_s26 }
  0x80   : > { %v325_v20 = vld.sshfl [vmem:[#allocation1] sm:$0xff pattern:$0x75316420]  ;;  %v326_v21 = vld.sshfl [vmem:[#allocation1 + $0x8] sm:$0xff pattern:$0x75316420] }
  0x81   : > { %335 = vst [vmem:[#allocation1] ss:$2 sm:$0xff] %v902_v0  ;;  %v659_v22 = vpack.i.bf16 %v326_v21, %v325_v20 }
  0x83   : > { %660 = vrot.lane.b32.xlu0 %v659_v22, %s783_s7 }
  0x88   : > { %v336_v23 = vld.sshfl [vmem:[#allocation1] sm:$0xff pattern:$0x75316420] }
  0x89   : > { %337 = vrot.lane.b32.xlu1 %v336_v23, %s783_s7  ;;  %347 = vst [vmem:[#allocation1] ss:$2 sm:$0xff] %v902_v0  ;;  %s727_s7 = scalar_lea.hbm %s726_s16, 16 }
  0x8a   : > { %p728_p6 = scmp.ne.s32.totalorder %s726_s16, %s727_s7 }
  0x8c   : > { %p729_p9 = pnand %p728_p6, %p858_p11 }
  0x8e   : > { %p730_p13 = pneg %p729_p9 }
  0x90   : > { %v348_v24 = vld.sshfl [vmem:[#allocation1] sm:$0xff pattern:$0x75316420]  ;;  %v349_v25 = vld.sshfl [vmem:[#allocation1 + $0x8] sm:$0xff pattern:$0x75316420] }
  0x91   : > { %229 = vrot.lane.b32.xlu1 %v226_v3, %s779_s23  ;;  %350 = vrot.lane.b32.xlu2 %v348_v24, %s784_s8  ;;  %358 = vst [vmem:[#allocation1] ss:$2 sm:$0xff] %v902_v0  ;;  %s188_s23 = scalar_lea.vmem [#allocation5], %s574_s22 }
  0x92   : > { %s493_s4 = sshll.u32 %s188_s23, 4  ;;  %s494_s4 = int_to_ptr.vmem [resolvable:$true] %s493_s4 }
  0x98   : > { %v359_v26 = vld.sshfl [vmem:[#allocation1] sm:$0xff pattern:$0x75316420] }
  0x99   : > { %v664_v27 = vpack.i.bf16 %v359_v26, %v349_v25  ;;  %366 = vst [vmem:[#allocation1] ss:$2 sm:$0xff] %v902_v0  ;;  %435 = vperm.xlu1 %679, %v432_v50  }
  0x9b   : > { %665 = vrot.lane.b32.xlu2 %v664_v27, %s784_s8 }
  0xa0   : > { %v367_v29 = vld.sshfl [vmem:[#allocation1] sm:$0xff pattern:$0x75316420]  ;;  %v368_v30 = vld.sshfl [vmem:[#allocation1 + $0x8] sm:$0xff pattern:$0x75316420] }
  0xa1   : > { %v669_v31 = vpack.i.bf16 %v368_v30, %v367_v29  ;;  %377 = vst [vmem:[#allocation1] ss:$2 sm:$0xff] %v902_v0 }
  0xa3   : > { %675 = vrot.lane.b32.xlu2 %v674_v28, %s785_s9  ;;  %670 = vrot.lane.b32.xlu0 %v669_v31, %s786_s10 }
  0xa5   : > { %v923_v33 = vpop.permute.xlu2 %645 }
  0xa6   : > { %v648_v43 = vunpack.i.h.bf16 %v923_v33  ;;  %v647_v44 = vunpack.i.l.bf16 %v923_v33 }
  0xa8   : > { %v378_v32 = vld.sshfl [vmem:[#allocation1] sm:$0xff pattern:$0x75316420]  ;;  %v260_v51 = vsel %vm256_vm0, %v647_v44, %v648_v43 }
  0xa9   : > { %399 = vst [vmem:[#allocation1] ss:$2 sm:$0xff] %v902_v0  ;;  %v261_v16 = vsel %vm238_vm11, %v260_v51, 0.0 }
  0xaa   : > { %v389_v31 = vrot.slane %v261_v16, 4 }
  0xab   : > { %379 = vrot.lane.b32.xlu0 %v378_v32, %s786_s10  ;;  %s731_s10 = scalar_lea.hbm %s1113_s3, 32 }
  0xac   : > { %p733_p1 = scmp.lt.s32.totalorder %s731_s10, %s727_s7 }
  0xad   : > { %v925_v34 = vpop.permute.xlu2 %254  ;;  %v929_v36 = vpop.permute.xlu0 %640 }
  0xae   : > { %v643_v55 = vunpack.i.h.bf16 %v929_v36  ;;  %v642_v56 = vunpack.i.l.bf16 %v929_v36  ;;  %p734_p3 = por %p733_p1, %p732_p0 }
  0xb0   : > { %v400_v24 = vld.sshfl [vmem:[#allocation1] sm:$0xff pattern:$0x75316420]  ;;  %v235_v27 = vsel %vm231_vm6, %v642_v56, %v643_v55  ;;  %v401_v56 = vld.sshfl [vmem:[#allocation1 + $0x8] sm:$0xff pattern:$0x75316420]  ;;  %p735_p4 = pnand %p734_p3, %p730_p13 }
  0xb3   : > { %273 = vrot.lane.b32.xlu0 %v270_v10, %s785_s9 }
  0xdb   : > { %v927_v35 = vpop.permute.xlu1 %296 }
  0xdd   : > { %v931_v39 = vpop.permute.xlu0 %650 }
  0xde   : > { %v653_v57 = vunpack.i.h.bf16 %v931_v39  ;;  %v652_v58 = vunpack.i.l.bf16 %v931_v39 }
  0xe0   : > { %v302_v5 = vsel %vm298_vm2, %v652_v58, %v653_v57  ;;  %v299_v58 = vsel %vm298_vm2, %v653_v57, %v927_v35 }
  0xe1   : > { %v303_v17 = vsel %vm971_vm9, %v302_v5, 0.0 }
  0xe2   : > { %v395_v32 = vrot.slane %v303_v17, 4 }
  0xe5   : > { %v656_v38 = vpop.permute.xlu1 %655 }
  0xe6   : > { %v658_v48 = vunpack.i.h.bf16 %v656_v38  ;;  %v657_v49 = vunpack.i.l.bf16 %v656_v38 }
  0xe8   : > { %v313_v63 = vsel %vm312_vm1, %v657_v49, %v658_v48 }
  0xe9   : > { %v322_v9 = vsel %vm967_vm8, %v313_v63, 0.0  ;;  %v257_v63 = vsel %vm256_vm0, %v648_v43, %v925_v34  ;;  %v431_v43 = vld [vmem:[%s1111_s1] sm:$0xf]  ;;  %vm438_vm0 = vcmask 293888  }
  0xea   : > { %v406_v21 = vrot.slane %v322_v9, 4  ;;  %v390_v5 = vrot.slane %v257_v63, 4 }
  0xeb   : > { %v351_v37 = vpop.permute.xlu2 %350 }
  0xed   : > { %v319_v46 = vpop.permute.xlu1 %318 }
  0xee   : > { %v321_v15 = vsel %vm312_vm1, %v658_v48, %v319_v46  ;;  %vm416_vm1 = vcmask 1043456  }
  0xef   : > { %v323_v30 = vsel %vm956_vm3, %v321_v15, 0.0  ;;  %v421_v41 = vsel %vm416_vm1, %v400_v24, %v406_v21 }
  0xf0   : > { %v407_v49 = vrot.slane %v323_v30, 4 }
  0xf2   : > { %v422_v39 = vsel %vm416_vm1, %v401_v56, %v407_v49 }
  0xf5   : > { %v666_v42 = vpop.permute.xlu2 %665  ;;  %v940_v47 = vpop.permute.xlu0 %660 }
  0xf6   : > { %v667_v59 = vunpack.i.l.bf16 %v666_v42  ;;  %v663_v60 = vunpack.i.h.bf16 %v940_v47  ;;  %v662_v61 = vunpack.i.l.bf16 %v940_v47  ;;  %v668_v4 = vunpack.i.h.bf16 %v666_v42 }
  0xf7   : > { %v242_v47 = vsel %vm1001_vm15, %v235_v27, 0.0 }
  0xf8   : > { %v355_v6 = vsel %vm354_vm4, %v351_v37, %v667_v59  ;;  %v332_v10 = vsel %vm331_vm5, %v662_v61, %v663_v60  ;;  %v363_v18 = vsel %vm354_vm4, %v667_v59, %v668_v4  ;;  %vm1015_vm4 = vmand %vm967_vm8, %vm238_vm11  ;;  %v304_v4 = vsel %vm963_vm7, %v299_v58, 0.0 }
  0xf9   : > { %v412_v19 = vrot.slane %v355_v6, 4  ;;  %v345_v23 = vsel %vm971_vm9, %v332_v10, 0.0  ;;  %vm1025_vm9 = vmand %vm963_vm7, %vm342_vm13  ;;  %v365_v38 = vsel %vm342_vm13, %v363_v18, 0.0  ;;  %v396_v6 = vrot.slane %v304_v4, 4 }
  0xfa   : > { %v413_v51 = vrot.slane %v365_v38, 4 }
  0xfb   : > { %v338_v7 = vpop.permute.xlu1 %337  ;;  %v423_v42 = vsel %vm416_vm1, %v345_v23, %v412_v19 }
  0xfc   : > { %v340_v44 = vsel %vm331_vm5, %v663_v60, %v338_v7  ;;  %v427_v53 = vpack.c.bf16 %v423_v42, %v421_v41  ;;  %v417_v60 = vsel %vm416_vm1, %v242_v47, %v389_v31 }
  0xfd   : > { %v961_v0 = vpop.permute.xlu2 %675  ;;  %v346_v54 = vsel %vm1025_vm9, %v340_v44, 0.0 }
  0xfe   : > { %v678_v11 = vunpack.i.h.bf16 %v961_v0  ;;  %v677_v12 = vunpack.i.l.bf16 %v961_v0  ;;  %v424_v35 = vsel %vm416_vm1, %v346_v54, %v413_v51 }
  0xff   : > { %v428_v36 = vpack.c.bf16 %v424_v35, %v422_v39 }
 0x100   : > { %v279_v28 = vsel %vm275_vm10, %v677_v12, %v678_v11 }
 0x101   : > { %v284_v48 = vsel %vm1015_vm4, %v279_v28, 0.0 }
 0x102   : > { %v419_v61 = vsel %vm416_vm1, %v284_v48, %v395_v32 }
 0x103   : > { %v230_v52 = vpop.permute.xlu1 %229  ;;  %v425_v57 = vpack.c.bf16 %v419_v61, %v417_v60 }
 0x104   : > { %v232_v2 = vsel %vm231_vm6, %v643_v55, %v230_v52 }
 0x105   : > { %v243_v33 = vsel %vm963_vm7, %v232_v2, 0.0 }
 0x106   : > { %v418_v1 = vsel %vm416_vm1, %v243_v33, %v390_v5 }
 0x10b   : > { %v436_v10 = vpop.permute.xlu1 %435 }
 0x115   : > { %v671_v8 = vpop.permute.xlu0 %670 }
 0x116   : > { %v673_v13 = vunpack.i.h.bf16 %v671_v8  ;;  %v672_v14 = vunpack.i.l.bf16 %v671_v8 }
 0x118   : > { %v374_v20 = vsel %vm373_vm12, %v672_v14, %v673_v13 }
 0x119   : > { %v385_v22 = vsel %vm967_vm8, %v374_v20, 0.0  ;;  %vm384_vm8 = vmand %vm956_vm3, %vm342_vm13 }
 0x11a   : > { %v429_v26 = vpack.c.bf16 %v385_v22, %v385_v22 }
 0x11c   : > { %v444_v40 = vsel %vm442_vm14, %v429_v26, 0 }
 0x11d   : > { %454 = vmatpush.bf16.msra.mxu0 %v444_v40  ;;  %v380_v46 = vpop.permute.xlu0 %379 }
 0x11e   : > { %v382_v50 = vsel %vm373_vm12, %v673_v13, %v380_v46 }
 0x11f   : > { %v386_v45 = vsel %vm384_vm8, %v382_v50, 0.0 }
 0x120   : > { %v430_v59 = vpack.c.bf16 %v386_v45, %v386_v45 }
 0x121   : > { %455 = vmatpush.bf16.msra.mxu0 %v427_v53 }
 0x122   : > { %v447_v3 = vsel %vm442_vm14, %v430_v59, 0 }
 0x123   : > { %467 = vmatpush.bf16.msra.mxu1 %v447_v3 }
 0x125   : > { %v274_v34 = vpop.permute.xlu0 %273  ;;  %456 = vmatpush.bf16.msra.mxu0 %v425_v57 }
 0x126   : > { %v276_v55 = vsel %vm275_vm10, %v678_v11, %v274_v34 }
 0x127   : > { %v285_v7 = vsel %vm956_vm3, %v276_v55, 0.0  ;;  %468 = vmatpush.bf16.msra.mxu1 %v428_v36 }
 0x128   : > { %575 = vmatmul.msk.bf16.vlgmr.msra.gmra.mxu0 %vm438_vm0, %v431_v43  ;;  %v420_v8 = vsel %vm416_vm1, %v285_v7, %v396_v6 }
 0x129   : > { %v426_v9 = vpack.c.bf16 %v420_v8, %v418_v1 }
 0x12b   : > { %469 = vmatpush.bf16.msra.mxu1 %v426_v9 }
 0x12e   : > { %576 = vmatmul.msk.bf16.vlgmr.msra.gmra.mxu1 %vm438_vm0, %v431_v43 }
 0x1a5   : > { %v458_v12 = vpop.f32.mrf.mxu0 }
 0x1a6   : > { %v459_v0 = vadd.f32 %v458_v12, %v436_v10 }
 0x1a8   : > { %v475_v11 = vmax.f32 %v459_v0, 0.0 }
 0x1aa   : > { %477 = vst [vmem:[%s188_s23] sm:$0xff] %v475_v11 }
 0x1ab   : > { %v471_v62 = vpop.f32.mrf.mxu1 }
 0x1ac   : > { %v472_v13 = vadd.f32 %v471_v62, %v436_v10 }
 0x1ad   : > { %v460_v14 = vpop.f32.mrf.mxu0 }
 0x1ae   : > { %v476_v15 = vmax.f32 %v472_v13, 0.0 }
 0x1b0   : > { %478 = vst [vmem:[%s188_s23 + $0x8] sm:$0xff] %v476_v15 }
 0x1b1   : > { %738 = shalt.err (!%p735_p4)
}
 0x1b2   : > { %586 = dma.vmem_to_hbm [thread:$0]  (%p858_p11), %s494_s4, 256, %s496_s5, %s480_s6  }
 0x1b3   : > { %v473_v16 = vpop.f32.mrf.mxu1 }
 0x1b4 PF: > { %s507_s26 = sand.u32 1, %s765_s12   ;;  %p1133_p7 = scmp.ge.s32.totalorder %s777_s15, 2 }
 0x1b5   : > { %s508_s19 = scalar_lea.sflag [#allocation4], %s507_s26 }
 0x1b6   : > { %p593_p5 = pnand %p1133_p7, %p862_p12 }
 0x1b8   : > { %p594_p8 = pneg %p593_p5 }
 0x1ba   : > { %760 = dma.done.wait (%p594_p8), %s508_s19, 256  }
 0x1bb   : > { %762 = vsyncadd (%p594_p8), %s508_s19, 4294967040  ;;  %p16_p10 = scmp.ge.s32.totalorder %s833_s18, 4   ;;  %s1134_s12 = smov %s769_s13 }
 0x1bc   : > { %s1135_s13 = smov %s773_s14  ;;  %s1136_s14 = smov %s845_s21 }
 0x1bd   : > { %s1137_s15 = smov %s833_s18  ;;  %18 = sbr.rel (!%p16_p10) target bundleno = 5 (0x5), region = 77 }
 0x1c2   :  { %514 = vsyncpa [#allocation3], 1 }
 0x1c3   :  { %516 = vsyncpa [#allocation3 + $0x1], 1 }
 0x1c4   :  { %517 = vsyncpa [#allocation4], 1 }
 0x1c5   :  { %519 = vsyncpa [#allocation4 + $0x1], 1 }

</bundles_post_ra>
